<compile_context>
chip_gen: v7x
topology: tpu7x:2x2x1
jax: 0.10.0
libtpu: 0.0.40
codegen_flags: <defaults>
</compile_context>

<pallas_src>
import functools

import jax
import jax.numpy as jnp
from jax import lax
from jax.experimental import pallas as pl
from jax.experimental.pallas import tpu as pltpu


# ------------------------------- tile helpers --------------------------------
def _pick_tile(dim, target, align):
    """Largest `align`-multiple divisor of `dim` that is <= target, else `dim`."""
    if dim <= target:
        return dim
    t = (target // align) * align
    while t >= align:
        if dim % t == 0:
            return t
        t -= align
    return dim  # fall back to the full dimension (no tiling)


_TM, _TN, _TK = 512, 512, 512
_VMEM_LIMIT = 48 * 1024 * 1024  # explicit scoped-VMEM budget; < v7x 64 MiB physical


# ----------------------------- LayerNorm kernel -------------------------------
def _layernorm_kernel(x_ref, a_ref, b_ref, o_ref, *, eps):
    x = x_ref[...].astype(jnp.float32)
    d = x.shape[-1]
    mean = jnp.mean(x, axis=-1, keepdims=True)
    # torch.std uses Bessel's correction (ddof=1); module divides by (std + eps)
    var = jnp.sum((x - mean) ** 2, axis=-1, keepdims=True) / (d - 1)
    inv = pl.reciprocal(jnp.sqrt(var) + eps, approx=True)   # EUP, not VPU divide
    y = a_ref[...] * (x - mean) * inv + b_ref[...]
    o_ref[...] = y.astype(o_ref.dtype)


def layer_norm(x2d, a, b, eps=1e-6):
    M, D = x2d.shape
    tm = _pick_tile(M, _TM, 8)
    return pl.pallas_call(
        functools.partial(_layernorm_kernel, eps=eps),
        out_shape=jax.ShapeDtypeStruct((M, D), x2d.dtype),
        grid=(M // tm,),
        in_specs=[
            pl.BlockSpec((tm, D), lambda i: (i, 0)),
            pl.BlockSpec((1, D), lambda i: (0, 0)),
            pl.BlockSpec((1, D), lambda i: (0, 0)),
        ],
        out_specs=pl.BlockSpec((tm, D), lambda i: (i, 0)),
        compiler_params=pltpu.CompilerParams(
            dimension_semantics=("parallel",),
            vmem_limit_bytes=_VMEM_LIMIT),
    )(x2d, a.reshape(1, D), b.reshape(1, D))


# ----------------------- Fused LayerNorm + Linear kernel ----------------------
# y = relu?( LN(x) @ W + bias ).  LN is computed only on the first N tile of each
# row block and cached (bf16) in VMEM scratch; all j tiles reuse it (no redundant
# VPU/EUP work).  K (= D) is not tiled because LN needs the full row.
def _ln_linear_kernel(x_ref, a_ref, b_ref, w_ref, bias_ref, o_ref, xn_ref,
                      *, eps, relu):
    @pl.when(pl.program_id(1) == 0)
    def _():
        x = x_ref[...].astype(jnp.float32)
        d = x.shape[-1]
        mean = jnp.mean(x, axis=-1, keepdims=True)
        var = jnp.sum((x - mean) ** 2, axis=-1, keepdims=True) / (d - 1)
        inv = pl.reciprocal(jnp.sqrt(var) + eps, approx=True)
        xn = a_ref[...] * (x - mean) * inv + b_ref[...]
        xn_ref[...] = xn.astype(xn_ref.dtype)          # bf16 MXU operand, cached

    y = jnp.dot(xn_ref[...], w_ref[...],               # bf16 x bf16 -> f32 acc
                preferred_element_type=jnp.float32)
    y = y + bias_ref[...]
    if relu:
        y = jnp.maximum(y, 0.0)
    o_ref[...] = y.astype(o_ref.dtype)


def ln_linear(x2d, ln_a, ln_b, w, bias, *, relu=False, eps=1e-6,
              out_dtype=jnp.bfloat16):
    M, D = x2d.shape
    _, N = w.shape
    tm = _pick_tile(M, _TM, 8)
    tn = _pick_tile(N, _TN, 128)
    return pl.pallas_call(
        functools.partial(_ln_linear_kernel, eps=eps, relu=relu),
        out_shape=jax.ShapeDtypeStruct((M, N), out_dtype),
        grid=(M // tm, N // tn),
        in_specs=[
            pl.BlockSpec((tm, D), lambda i, j: (i, 0)),
            pl.BlockSpec((1, D), lambda i, j: (0, 0)),
            pl.BlockSpec((1, D), lambda i, j: (0, 0)),
            pl.BlockSpec((D, tn), lambda i, j: (0, j)),
            pl.BlockSpec((1, tn), lambda i, j: (0, j)),
        ],
        out_specs=pl.BlockSpec((tm, tn), lambda i, j: (i, j)),
        scratch_shapes=[pltpu.VMEM((tm, D), jnp.bfloat16)],
        compiler_params=pltpu.CompilerParams(
            # j depends on the LN scratch written at j == 0 -> "arbitrary"
            dimension_semantics=("parallel", "arbitrary"),
            vmem_limit_bytes=_VMEM_LIMIT),
    )(x2d, ln_a.reshape(1, D), ln_b.reshape(1, D), w, bias.reshape(1, N))


# ------------------ Linear + bias + residual (K-tiled) kernel -----------------
# out = res + x @ W + bias, grid (M/TM, N/TN, K/TK).  Output dtype is f32
# (residual stream), so we accumulate directly into the resident output block:
# bias + residual are folded in at k == 0 and the matmul partials added per k.
def _linear_residual_kernel(x_ref, w_ref, bias_ref, res_ref, o_ref):
    @pl.when(pl.program_id(2) == 0)
    def _():
        o_ref[...] = res_ref[...].astype(jnp.float32) + bias_ref[...]

    o_ref[...] += jnp.dot(x_ref[...].astype(jnp.bfloat16), w_ref[...],
                          preferred_element_type=jnp.float32)


def linear_residual(x2d, w, bias, res2d):
    M, K = x2d.shape
    _, N = w.shape
    tm = _pick_tile(M, _TM, 8)
    tn = _pick_tile(N, _TN, 128)
    tk = _pick_tile(K, _TK, 128)
    return pl.pallas_call(
        _linear_residual_kernel,
        out_shape=jax.ShapeDtypeStruct((M, N), jnp.float32),
        grid=(M // tm, N // tn, K // tk),
        in_specs=[
            pl.BlockSpec((tm, tk), lambda i, j, k: (i, k)),
            pl.BlockSpec((tk, tn), lambda i, j, k: (k, j)),
            pl.BlockSpec((1, tn), lambda i, j, k: (0, j)),
            pl.BlockSpec((tm, tn), lambda i, j, k: (i, j)),
        ],
        out_specs=pl.BlockSpec((tm, tn), lambda i, j, k: (i, j)),
        compiler_params=pltpu.CompilerParams(
            dimension_semantics=("parallel", "parallel", "arbitrary"),
            vmem_limit_bytes=_VMEM_LIMIT),
    )(x2d, w, bias.reshape(1, N), res2d)


# ----------------------- Scaled dot-product attention -------------------------
# One batch per grid step.  The fused QKV slab arrives through a single
# lane-dense (1, S, 3D) block (one DMA descriptor); heads are sliced with static
# lane offsets.  The padding mask is rebuilt in-kernel from scalar-prefetched
# per-batch key lengths.  Head outputs are concatenated and written with a
# single lane-dense (S, D) store.  `att` is written only when requested.
# TODO(synk): flash-tile the KV axis / put heads on the grid for long sequences.
def _attention_kernel(len_ref, qkv_ref, o_ref, att_ref=None, *,
                      n_heads, head_dim, d_model, scale):
    b = pl.program_id(0)
    length = len_ref[b]
    S = qkv_ref.shape[1]
    col = lax.broadcasted_iota(jnp.int32, (S, S), 1)
    key_ok = col < length  # padding mask: key j valid iff j < length[b]

    outs = []
    for h in range(n_heads):  # static lane offsets; per-head scores die each iter
        q0 = h * head_dim
        q = qkv_ref[0, :, q0:q0 + head_dim].astype(jnp.float32) * scale
        k = qkv_ref[0, :, d_model + q0:d_model + q0 + head_dim]
        v = qkv_ref[0, :, 2 * d_model + q0:2 * d_model + q0 + head_dim]
        # contract last dims -> no explicit k.T materialization; bf16 MXU operands
        s = lax.dot_general(q.astype(jnp.bfloat16), k, (((1,), (1,)), ((), ())),
                            preferred_element_type=jnp.float32)  # (S, S) f32
        s = jnp.where(key_ok, s, jnp.float32(-1e9))
        s = s - jnp.max(s, axis=-1, keepdims=True)
        e = jnp.exp(s)
        p = e * pl.reciprocal(jnp.sum(e, axis=-1, keepdims=True), approx=True)
        o = jnp.dot(p.astype(jnp.bfloat16), v,
                    preferred_element_type=jnp.float32)          # (S, Dh) f32
        outs.append(o.astype(o_ref.dtype))
        if att_ref is not None:
            att_ref[0, h] = p.astype(att_ref.dtype)
    o_ref[0] = jnp.concatenate(outs, axis=-1)  # single lane-dense (S, D) store


def attention(qkv3d, lengths, n_heads, head_dim, need_att):
    """qkv3d: (B, S, 3*D) bf16 fused QKV slab; lengths: (B,) int32 key lengths."""
    B, S, threeD = qkv3d.shape
    D = threeD // 3
    scale = 1.0 / float(head_dim) ** 0.5

    out_shapes = [jax.ShapeDtypeStruct((B, S, D), jnp.bfloat16)]
    out_specs = [pl.BlockSpec((1, S, D), lambda b, lens: (b, 0, 0))]
    if need_att:
        out_shapes.append(jax.ShapeDtypeStruct((B, n_heads, S, S), jnp.float32))
        out_specs.append(
            pl.BlockSpec((1, n_heads, S, S), lambda b, lens: (b, 0, 0, 0)))

    grid_spec = pltpu.PrefetchScalarGridSpec(
        num_scalar_prefetch=1,
        grid=(B,),
        in_specs=[pl.BlockSpec((1, S, threeD), lambda b, lens: (b, 0, 0))],
        out_specs=tuple(out_specs) if need_att else out_specs[0],
    )
    out = pl.pallas_call(
        functools.partial(_attention_kernel, n_heads=n_heads,
                          head_dim=head_dim, d_model=D, scale=scale),
        out_shape=tuple(out_shapes) if need_att else out_shapes[0],
        grid_spec=grid_spec,
        compiler_params=pltpu.CompilerParams(
            dimension_semantics=("parallel",),
            vmem_limit_bytes=_VMEM_LIMIT),
    )(lengths, qkv3d)
    if need_att:
        return out[0], out[1]
    return out, None


# ------------------------------ Encoder layers --------------------------------
def encoder_layer(x2d, lengths, p, B, S, need_att):
    """Pre-norm MHA + FFN sublayers with residual connections. Returns (x2d, att)."""
    M, D = x2d.shape
    H = p["heads"]
    Dh = D // H

    # sublayer 1: fused LN + QKV projection, attention, out-proj + residual
    qkv = ln_linear(x2d, p["ln1_a"], p["ln1_b"], p["wqkv"], p["bqkv"])  # (M,3D) bf16
    qkv = qkv.reshape(B, S, 3 * D)                                      # metadata only
    o, att = attention(qkv, lengths, H, Dh, need_att)                   # (B,S,D) bf16
    o2d = o.reshape(M, D)                                               # metadata only
    x2d = linear_residual(o2d, p["wo"], p["bo"], x2d)                   # f32 residual

    # sublayer 2: fused LN + FFN-1 (+ReLU), then FFN-2 + residual
    h = ln_linear(x2d, p["ln2_a"], p["ln2_b"], p["w1"], p["b1"], relu=True)
    x2d = linear_residual(h, p["w2"], p["b2"], x2d)

    return x2d, att


def encoder_forward(x, mask, mask1, mask2, params):
    """Mirrors Encoder.forward: loop over layers, return (final_norm(x), att)."""
    # TODO(synk): the concrete `layer` class is not defined in the source module;
    # mask1/mask2 are accepted for signature parity but unused by this layer.
    del mask1, mask2
    B, S, D = x.shape
    # TODO(synk): assumes `mask` is a key-padding mask (per-batch key lengths);
    # arbitrary dense masks (e.g. causal) would need the dense-mask path.
    lengths = jnp.sum(mask[:, 0, 0, :] > 0, axis=-1).astype(jnp.int32)  # (B,)

    x2 = x.reshape(B * S, D)
    att = None
    n_layers = len(params["layers"])
    for li, p in enumerate(params["layers"]):
        # att is only written to HBM for the last layer (the only one returned)
        x2, a = encoder_layer(x2, lengths, p, B, S, need_att=(li == n_layers - 1))
        if a is not None:
            att = a
    out = layer_norm(x2, params["norm_a"], params["norm_b"]).reshape(B, S, D)
    return out, att


# --------------------------------- Params -------------------------------------
def init_params(key, n_layers, d_model, n_heads, d_ff):
    wdt = jnp.bfloat16  # MXU-native weight storage (halves weight DMA/VMEM)
    layers = []
    for i in range(n_layers):
        k = jax.random.fold_in(key, i)
        ks = jax.random.split(k, 6)
        s = 0.02
        wq = s * jax.random.normal(ks[0], (d_model, d_model), jnp.float32)
        wk = s * jax.random.normal(ks[1], (d_model, d_model), jnp.float32)
        wv = s * jax.random.normal(ks[2], (d_model, d_model), jnp.float32)
        layers.append(
            dict(
                heads=n_heads,
                # fused QKV projection: one (D, 3D) GEMM instead of three
                wqkv=jnp.concatenate([wq, wk, wv], axis=1).astype(wdt),
                bqkv=jnp.zeros((3 * d_model,), jnp.float32),
                wo=(s * jax.random.normal(ks[3], (d_model, d_model))).astype(wdt),
                bo=jnp.zeros((d_model,), jnp.float32),
                w1=(s * jax.random.normal(ks[4], (d_model, d_ff))).astype(wdt),
                b1=jnp.zeros((d_ff,), jnp.float32),
                w2=(s * jax.random.normal(ks[5], (d_ff, d_model))).astype(wdt),
                b2=jnp.zeros((d_model,), jnp.float32),
                ln1_a=jnp.ones((d_model,), jnp.float32),
                ln1_b=jnp.zeros((d_model,), jnp.float32),
                ln2_a=jnp.ones((d_model,), jnp.float32),
                ln2_b=jnp.zeros((d_model,), jnp.float32),
            )
        )
    return dict(
        layers=layers,
        norm_a=jnp.ones((d_model,), jnp.float32),
        norm_b=jnp.zeros((d_model,), jnp.float32),
    )


if __name__ == "__main__":
    B, S, D, H, DFF, N_LAYERS = 2, 8, 32, 4, 64, 2

    key = jax.random.PRNGKey(0)
    kx, kp = jax.random.split(key)
    x = jax.random.normal(kx, (B, S, D), jnp.float32)

    # padding-style attention mask: (B, 1, S, S), 1 = attend, 0 = masked
    lengths = jnp.array([S, S - 2])
    col = jnp.arange(S)[None, None, None, :]
    mask = (col < lengths[:, None, None, None]).astype(jnp.float32)
    mask = jnp.broadcast_to(mask, (B, 1, S, S))
    mask1 = jnp.ones((B, 1, S, S), jnp.float32)
    mask2 = jnp.ones((B, 1, S, S), jnp.float32)

    params = init_params(kp, N_LAYERS, D, H, DFF)

    out, att = encoder_forward(x, mask, mask1, mask2, params)
    jax.block_until_ready((out, att))

    assert out.shape == (B, S, D)
    assert out.dtype == jnp.float32
    assert att.shape == (B, H, S, S)
    assert bool(jnp.all(jnp.isfinite(out)))
    assert bool(jnp.all(jnp.isfinite(att)))
    print("KERNEL_OK")
</pallas_src>

<mosaic_0001>
module attributes {stable_mosaic.version = 11 : i64} {
  func.func @_ln_linear_kernel(%arg0: i32, %arg1: i32, %arg2: memref<16x32xf32, #tpu.memory_space<vmem>>, %arg3: memref<1x32xf32, #tpu.memory_space<vmem>>, %arg4: memref<1x32xf32, #tpu.memory_space<vmem>>, %arg5: memref<32x96xbf16, #tpu.memory_space<vmem>>, %arg6: memref<1x96xf32, #tpu.memory_space<vmem>>, %arg7: memref<16x96xbf16, #tpu.memory_space<vmem>>, %arg8: memref<16x32xbf16, #tpu.memory_space<vmem>>) attributes {dimension_semantics = [#tpu.dimension_semantics<parallel>, #tpu.dimension_semantics<arbitrary>], iteration_bounds = array<i64: 1, 1>, scalar_prefetch = 0 : i64, scratch_operands = 1 : i64, tpu.core_type = #tpu.core_type<tc>, window_params = [{transform_indices = @transform_0, window_bounds = array<i64: 16, 32>}, {pipeline_mode = #tpu.pipeline_mode<synchronous>, transform_indices = @transform_1, window_bounds = array<i64: 1, 32>}, {pipeline_mode = #tpu.pipeline_mode<synchronous>, transform_indices = @transform_2, window_bounds = array<i64: 1, 32>}, {transform_indices = @transform_3, window_bounds = array<i64: 32, 96>}, {transform_indices = @transform_4, window_bounds = array<i64: 1, 96>}, {transform_indices = @transform_5, window_bounds = array<i64: 16, 96>}]} {
    %c0_i32 = arith.constant 0 : i32
    %0 = arith.cmpi eq, %arg1, %c0_i32 : i32
    %1 = arith.extui %0 : i1 to i32
    %c0_i32_0 = arith.constant 0 : i32
    %2 = arith.cmpi ne, %1, %c0_i32_0 : i32
    scf.if %2 {
      %c0_8 = arith.constant 0 : index
      %c0_9 = arith.constant 0 : index
      %11 = vector.load %arg2[%c0_8, %c0_9] : memref<16x32xf32, #tpu.memory_space<vmem>>, vector<16x32xf32>
      %cst_10 = arith.constant dense<0.000000e+00> : vector<16xf32>
      %12 = vector.multi_reduction <add>, %11, %cst_10 [1] : vector<16x32xf32> to vector<16xf32>
      %13 = vector.shape_cast %12 : vector<16xf32> to vector<16x1xf32>
      %cst_11 = arith.constant 3.200000e+01 : f32
      %14 = vector.broadcast %cst_11 : f32 to vector<16x1xf32>
      %15 = arith.divf %13, %14 : vector<16x1xf32>
      %16 = vector.broadcast %15 : vector<16x1xf32> to vector<16x32xf32>
      %17 = arith.subf %11, %16 : vector<16x32xf32>
      %18 = arith.mulf %17, %17 : vector<16x32xf32>
      %cst_12 = arith.constant dense<0.000000e+00> : vector<16xf32>
      %19 = vector.multi_reduction <add>, %18, %cst_12 [1] : vector<16x32xf32> to vector<16xf32>
      %20 = vector.shape_cast %19 : vector<16xf32> to vector<16x1xf32>
      %cst_13 = arith.constant 3.100000e+01 : f32
      %21 = vector.broadcast %cst_13 : f32 to vector<16x1xf32>
      %22 = arith.divf %20, %21 : vector<16x1xf32>
      %23 = math.sqrt %22 : vector<16x1xf32>
      %cst_14 = arith.constant 9.99999997E-7 : f32
      %24 = vector.broadcast %cst_14 : f32 to vector<16x1xf32>
      %25 = arith.addf %23, %24 : vector<16x1xf32>
      %26 = tpu.reciprocal %25 {approx = true} : vector<16x1xf32> -> vector<16x1xf32>
      %c0_15 = arith.constant 0 : index
      %c0_16 = arith.constant 0 : index
      %27 = vector.load %arg3[%c0_15, %c0_16] : memref<1x32xf32, #tpu.memory_space<vmem>>, vector<1x32xf32>
      %28 = vector.broadcast %15 : vector<16x1xf32> to vector<16x32xf32>
      %29 = arith.subf %11, %28 : vector<16x32xf32>
      %30 = vector.broadcast %27 : vector<1x32xf32> to vector<16x32xf32>
      %31 = arith.mulf %30, %29 : vector<16x32xf32>
      %32 = vector.broadcast %26 : vector<16x1xf32> to vector<16x32xf32>
      %33 = arith.mulf %31, %32 : vector<16x32xf32>
      %c0_17 = arith.constant 0 : index
      %c0_18 = arith.constant 0 : index
      %34 = vector.load %arg4[%c0_17, %c0_18] : memref<1x32xf32, #tpu.memory_space<vmem>>, vector<1x32xf32>
      %35 = vector.broadcast %34 : vector<1x32xf32> to vector<16x32xf32>
      %36 = arith.addf %33, %35 : vector<16x32xf32>
      %37 = arith.truncf %36 : vector<16x32xf32> to vector<16x32xbf16>
      %c0_19 = arith.constant 0 : index
      %c0_20 = arith.constant 0 : index
      %38 = vector.load %arg8[%c0_19, %c0_20] : memref<16x32xbf16, #tpu.memory_space<vmem>>, vector<16x32xbf16>
      tpu.vector_store %arg8[%c0_19, %c0_20], %37 {strides = array<i32>} : memref<16x32xbf16, #tpu.memory_space<vmem>>, vector<16x32xbf16>,
    } else {
    }
    %c0 = arith.constant 0 : index
    %c0_1 = arith.constant 0 : index
    %3 = vector.load %arg8[%c0, %c0_1] : memref<16x32xbf16, #tpu.memory_space<vmem>>, vector<16x32xbf16>
    %c0_2 = arith.constant 0 : index
    %c0_3 = arith.constant 0 : index
    %4 = vector.load %arg5[%c0_2, %c0_3] : memref<32x96xbf16, #tpu.memory_space<vmem>>, vector<32x96xbf16>
    %cst = arith.constant dense<0.000000e+00> : vector<16x96xf32>
    %5 = tpu.matmul %3, %4, %cst {dimension_numbers = #tpu.dot_dimension_numbers<[1], [0], [0], [1], [0, 0, 1, 1], [], []>} : vector<16x32xbf16>, vector<32x96xbf16>, vector<16x96xf32> -> vector<16x96xf32>
    %c0_4 = arith.constant 0 : index
    %c0_5 = arith.constant 0 : index
    %6 = vector.load %arg6[%c0_4, %c0_5] : memref<1x96xf32, #tpu.memory_space<vmem>>, vector<1x96xf32>
    %7 = vector.broadcast %6 : vector<1x96xf32> to vector<16x96xf32>
    %8 = arith.addf %5, %7 : vector<16x96xf32>
    %9 = arith.truncf %8 : vector<16x96xf32> to vector<16x96xbf16>
    %c0_6 = arith.constant 0 : index
    %c0_7 = arith.constant 0 : index
    %10 = vector.load %arg7[%c0_6, %c0_7] : memref<16x96xbf16, #tpu.memory_space<vmem>>, vector<16x96xbf16>
    tpu.vector_store %arg7[%c0_6, %c0_7], %9 {strides = array<i32>} : memref<16x96xbf16, #tpu.memory_space<vmem>>, vector<16x96xbf16>,
    return
  }
  func.func @transform_0(%arg0: i32, %arg1: i32) -> (i32, i32) {
    %c0_i32 = arith.constant 0 : i32
    %c0_i32_0 = arith.constant 0 : i32
    return %arg0, %c0_i32 : i32, i32
  }
  func.func @transform_1(%arg0: i32, %arg1: i32) -> (i32, i32) {
    %c0_i32 = arith.constant 0 : i32
    %c0_i32_0 = arith.constant 0 : i32
    %c0_i32_1 = arith.constant 0 : i32
    return %c0_i32, %c0_i32_0 : i32, i32
  }
  func.func @transform_2(%arg0: i32, %arg1: i32) -> (i32, i32) {
    %c0_i32 = arith.constant 0 : i32
    %c0_i32_0 = arith.constant 0 : i32
    %c0_i32_1 = arith.constant 0 : i32
    return %c0_i32, %c0_i32_0 : i32, i32
  }
  func.func @transform_3(%arg0: i32, %arg1: i32) -> (i32, i32) {
    %c0_i32 = arith.constant 0 : i32
    %c0_i32_0 = arith.constant 0 : i32
    return %c0_i32, %arg1 : i32, i32
  }
  func.func @transform_4(%arg0: i32, %arg1: i32) -> (i32, i32) {
    %c0_i32 = arith.constant 0 : i32
    %c0_i32_0 = arith.constant 0 : i32
    return %c0_i32, %arg1 : i32, i32
  }
  func.func @transform_5(%arg0: i32, %arg1: i32) -> (i32, i32) {
    %c0_i32 = arith.constant 0 : i32
    return %arg0, %arg1 : i32, i32
  }
}

</mosaic_0001>

<bundles_post_ra>
// kernel: tpu_custom_call.1
= control target key start
LH: loop header
LB: loop body
LE: loop exit
PB: predicated region body
PF: predicated region fallthrough
CT: control target
= control target key end

     0   :  { %10 = vsyncpa [#allocation4], 0  ;;  %s425_s0 = inlined_call_operand.hbm [shape: f32[16,32], index: 0, kind: input, shape index: {}]   ;;  %s426_s1 = inlined_call_operand.vmem [shape: f32[1,32], index: 1, kind: input, shape index: {}]   ;;  %s427_s2 = inlined_call_operand.vmem [shape: f32[1,32], index: 2, kind: input, shape index: {}]   ;;  %s428_s3 = inlined_call_operand.hbm [shape: bf16[32,96], index: 3, kind: input, shape index: {}]   ;;  %s429_s4 = inlined_call_operand.vmem [shape: f32[1,96], index: 4, kind: input, shape index: {}]   ;;  %s430_s5 = inlined_call_operand.hbm [shape: bf16[16,96], index: 5, kind: output, shape index: {}]  }
   0x1   :  { %11 = vsyncpa [#allocation7], 0 }
   0x2   :  { %12 = vsyncpa [#allocation5], 0  ;;  %s329_s18 = smov [#allocation3]   ;;  %s257_s22 = scalar_lea.hbm %s425_s0, 256 }
   0x3   :  { %s18_s19 = sshll.u32 %s329_s18, 4  ;;  %p258_p0 = scmp.ne.s32.totalorder %s425_s0, %s257_s22  ;;  %s19_s19 = int_to_ptr.vmem [resolvable:$true] %s18_s19 }
   0x4   :  { %p261_p1 = scmp.lt.u32.totalorder %s257_s22, %s425_s0 }
   0x6   :  { %p263_p2 = pnand %p261_p1, %p258_p0 }
   0x8   :  { %266 = shalt.err (!%p263_p2)
}
   0x9   :  { %s267_s27 = scalar_lea.vmem %s19_s19, 256  ;;  %p272_p4 = scmp.lt.s32.totalorder %s19_s19, %s19_s19 }
   0xa   :  { %p268_p3 = scmp.ne.s32.totalorder %s19_s19, %s267_s27  ;;  %p273_p5 = scmp.lt.s32.totalorder %s267_s27, %s267_s27 }
   0xc   :  { %p274_p6 = por %p273_p5, %p272_p4 }
   0xe   :  { %p275_p7 = pnand %p274_p6, %p268_p3 }
  0x10   :  { %278 = shalt.err (!%p275_p7)
}
  0x11   :  { %s330_s28 = smov 128   ;;  %s331_s29 = smov 8  }
  0x12   :  { %24 = dma.hbm_to_vmem [thread:$0]  %s425_s0, 256, %s19_s19, [#allocation4], %s330_s28, %s330_s28, %s331_s29  }
  0x13   :  { %s332_s7 = smov [#allocation6]   ;;  %s279_s11 = scalar_lea.hbm %s428_s3, 256 }
  0x14   :  { %s34_s8 = sshll.u32 %s332_s7, 4  ;;  %p280_p8 = scmp.ne.s32.totalorder %s428_s3, %s279_s11  ;;  %s35_s8 = int_to_ptr.vmem [resolvable:$true] %s34_s8 }
  0x15   :  { %p283_p9 = scmp.lt.u32.totalorder %s279_s11, %s428_s3 }
  0x17   :  { %p285_p10 = pnand %p283_p9, %p280_p8 }
  0x19   :  { %288 = shalt.err (!%p285_p10)
}
  0x1a   :  { %s289_s16 = scalar_lea.vmem %s35_s8, 256  ;;  %p294_p12 = scmp.lt.s32.totalorder %s35_s8, %s35_s8 }
  0x1b   :  { %p290_p11 = scmp.ne.s32.totalorder %s35_s8, %s289_s16  ;;  %p295_p13 = scmp.lt.s32.totalorder %s289_s16, %s289_s16 }
  0x1d   :  { %p296_p0 = por %p295_p13, %p294_p12 }
  0x1f   :  { %p297_p1 = pnand %p296_p0, %p290_p11 }
  0x21   :  { %300 = shalt.err (!%p297_p1)
}
  0x22   :  { %s333_s0 = smov 64   ;;  %s334_s17 = smov 4  }
  0x23   :  { %40 = dma.hbm_to_vmem [thread:$0]  %s428_s3, 256, %s35_s8, [#allocation7], %s333_s0, %s333_s0, %s334_s17  }
  0x24   :  { %323 = dma.done.wait [#allocation4], 256  }
  0x25   :  { %324 = vsyncadd [#allocation4], 4294967040 }
  0x26   :  { %325 = dma.done.wait [#allocation7], 256  }
  0x27   :  { %326 = vsyncadd [#allocation7], 4294967040  ;;  %vm56_vm0 = vcmask 261120   ;;  %v54_v0 = vld [vmem:[#allocation3] sm:$0xff]  ;;  %v55_v1 = vld [vmem:[#allocation3 + $0x8] sm:$0xff]  ;;  %v335_v15 = vmov 0.0  }
  0x28   :  { %v57_v2 = vsel %vm56_vm0, %v54_v0, 0.0  ;;  %v60_v3 = vsel %vm56_vm0, %v55_v1, 0.0  ;;  %v247_v14 = vld [vmem:[#allocation6] sm:$0xff]   ;;  %230 = vmatprep.subr.bf16.mxu0 %v335_v15  ;;  %v248_v16 = vld [vmem:[#allocation6 + $0x8] sm:$0xff]   ;;  %vm336_vm1 = vmmov 0   ;;  %vm196_vm6 = vcmask 781312  }
  0x29   :  { %58 = vadd.xlane.f32.xlu0 %v57_v2  ;;  %231 = vmatpush3.bf16.msra.mxu0 %v247_v14  ;;  %v217_v33 = vld [vmem:[%s426_s1] ss:$0 sm:$0xff]  ;;  %s337_s24 = smov [#allocation8]  }
  0x2a   :  { %234 = vmatprep.mubr.msk.bf16.mxu0 %vm336_vm1, %v335_v15  ;;  %232 = vmatprep.subr.bf16.mxu0 %v335_v15  ;;  %v218_v39 = vld [vmem:[%s427_s2] ss:$0 sm:$0xff]  ;;  %s204_s2 = sshll.u32 %s337_s24, 4  ;;  %s205_s2 = int_to_ptr.vmem [resolvable:$true] %s204_s2 }
  0x2b   :  { %v219_v45 = vld [vmem:[%s429_s4] ss:$0 sm:$0xff]  ;;  %s301_s25 = scalar_lea.vmem %s205_s2, 128  ;;  %p306_p3 = scmp.lt.s32.totalorder %s205_s2, %s205_s2 }
  0x2c   :  { %p302_p2 = scmp.ne.s32.totalorder %s205_s2, %s301_s25  ;;  %p307_p4 = scmp.lt.s32.totalorder %s301_s25, %s301_s25 }
  0x2d   :  { %61 = vadd.xlane.f32.xlu0 %v60_v3  ;;  %233 = vmatpush3.bf16.msra.mxu0 %v248_v16 }
  0x2e   :  { %p308_p5 = por %p307_p4, %p306_p3 }
  0x30   :  { %p309_p6 = pnand %p308_p5, %p302_p2 }
  0xb6   :  { %v59_v4 = vpop.xlane.xlu0 %58 }
  0xb7   :  { %v64_v5 = vmul.f32 0.03125, %v59_v4 }
  0xb9   :  { %v66_v6 = vsub.f32 %v54_v0, %v64_v5 }
  0xba   :  { %v62_v7 = vpop.xlane.xlu0 %61 }
  0xbb   :  { %v65_v8 = vmul.f32 0.03125, %v62_v7  ;;  %v68_v9 = vmul.f32 %v66_v6, %v66_v6  ;;  %v104_v35 = vmul.f32 %v217_v33, %v66_v6 }
  0xbd   :  { %v67_v10 = vsub.f32 %v55_v1, %v65_v8  ;;  %v70_v11 = vsel %vm56_vm0, %v68_v9, 0.0 }
  0xbe   :  { %71 = vadd.xlane.f32.xlu1 %v70_v11 }
  0xbf   :  { %v69_v12 = vmul.f32 %v67_v10, %v67_v10  ;;  %v105_v36 = vmul.f32 %v217_v33, %v67_v10 }
  0xc1   :  { %v73_v13 = vsel %vm56_vm0, %v69_v12, 0.0 }
  0xc2   :  { %74 = vadd.xlane.f32.xlu1 %v73_v13 }
 0x14b   :  { %v72_v17 = vpop.xlane.xlu1 %71 }
 0x14c   :  { %v77_v18 = vmul.f32 0.032258064, %v72_v17 }
 0x14e   :  { %249 = vrsqrt.f32 %v77_v18  ;;  %vm81_vm2 = vcmp.eq.f32.partialorder %v77_v18, inf  ;;  %v84_v23 = vand.u32 2147483648, %v77_v18  ;;  %vm83_vm3 = vcmp.eq.f32.partialorder %v77_v18, 0.0 }
 0x14f   :  { %v75_v19 = vpop.xlane.xlu1 %74 }
 0x150   :  { %v78_v20 = vmul.f32 0.032258064, %v75_v19 }
 0x152   :  { %251 = vrsqrt.f32 %v78_v20  ;;  %vm88_vm4 = vcmp.eq.f32.partialorder %v78_v20, inf  ;;  %v91_v29 = vand.u32 2147483648, %v78_v20  ;;  %vm90_vm5 = vcmp.eq.f32.partialorder %v78_v20, 0.0 }
 0x158   :  { %v250_v21 = vpop.eup %249 }
 0x159   :  { %v80_v22 = vmul.f32 %v250_v21, %v77_v18 }
 0x15b   :  { %v82_v24 = vsel %vm81_vm2, %v77_v18, %v80_v22 }
 0x15c   :  { %v252_v25 = vpop.eup %251  ;;  %v85_v26 = vsel %vm83_vm3, %v84_v23, %v82_v24 }
 0x15d   :  { %v93_v27 = vadd.f32 1e-06, %v85_v26  ;;  %v87_v28 = vmul.f32 %v252_v25, %v78_v20 }
 0x15f   :  { %253 = vrcp.f32 %v93_v27  ;;  %v89_v30 = vsel %vm88_vm4, %v78_v20, %v87_v28 }
 0x160   :  { %v92_v31 = vsel %vm90_vm5, %v91_v29, %v89_v30 }
 0x161   :  { %v94_v32 = vadd.f32 1e-06, %v92_v31 }
 0x163   :  { %255 = vrcp.f32 %v94_v32 }
 0x169   :  { %v254_v34 = vpop.eup %253 }
 0x16a   :  { %v106_v37 = vmul.f32 %v254_v34, %v104_v35 }
 0x16c   :  { %v115_v41 = vadd.f32 %v218_v39, %v106_v37 }
 0x16d   :  { %v256_v38 = vpop.eup %255 }
 0x16e   :  { %v107_v40 = vmul.f32 %v256_v38, %v105_v36 }
 0x170   :  { %v116_v42 = vadd.f32 %v218_v39, %v107_v40 }
 0x172   :  { %v117_v43 = vpack.c.bf16 %v116_v42, %v115_v41 }
 0x174   :  { %118 = vst.msk [vmem:[#allocation2] sm:$0xff] %vm56_vm0, %v117_v43 }
 0x17b   :  { %v119_v44 = vld [vmem:[#allocation2] sm:$0xff] }
 0x17c   :  { %235 = vmatmul.mubr.msk.bf16.vlgmr.msra.gmra.mrb[0].mxu0 %vm56_vm0, %v119_v44 }
 0x24f   :  { %v181_v46 = vpop.f32.mrb[0].mxu0 }
 0x250   :  { %v182_v47 = vadd.f32 %v219_v45, %v181_v46  ;;  %v236_v48 = vpop.f32.mrb[1].mxu0 }
 0x251   :  { %v184_v49 = vpop.f32.mrb[2].mxu0 }
 0x252   :  { %v225_v50 = vpack.c.bf16 %v182_v47, %v182_v47  ;;  %v185_v51 = vadd.f32 %v219_v45, %v184_v49  ;;  %v237_v52 = vpop.f32.mrb[3].mxu0 }
 0x254   :  { %v226_v53 = vpack.c.bf16 %v185_v51, %v185_v51  ;;  %197 = vst.msk [vmem:[#allocation8] sm:$0xf] %vm196_vm6, %v225_v50 }
 0x256   :  { %198 = vst.msk [vmem:[#allocation8 + $0x4] sm:$0xf] %vm196_vm6, %v226_v53 }
 0x257   :  { %312 = shalt.err (!%p309_p6)
}
 0x258   :  { %s313_s27 = scalar_lea.hbm %s430_s5, 128 }
 0x259   :  { %p314_p7 = scmp.ne.s32.totalorder %s430_s5, %s313_s27  ;;  %p317_p8 = scmp.lt.u32.totalorder %s313_s27, %s430_s5 }
 0x25b   :  { %p319_p9 = pnand %p317_p8, %p314_p7 }
 0x25d   :  { %322 = shalt.err (!%p319_p9)
}
 0x25e   :  { %210 = dma.vmem_to_hbm [thread:$0]  %s205_s2, 128, %s430_s5, [#allocation5], %s333_s0, %s333_s0, %s334_s17  }
 0x25f   :  { %327 = dma.done.wait [#allocation5], 128  }
 0x260   :  { %328 = vsyncadd [#allocation5], 4294967168 }
 0x261   :  { %214 = vsyncpa [#allocation4], 1 }
 0x262   :  { %215 = vsyncpa [#allocation7], 1 }
 0x263   :  { %216 = vsyncpa [#allocation5], 1 }

</bundles_post_ra>
